<compile_context>
chip_gen: v6e
topology: v6e:2x2x1
jax: 0.10.0
libtpu: 0.0.40
codegen_flags: <defaults>
</compile_context>

<pallas_src>
import functools
import math

import jax
import jax.numpy as jnp
from jax import lax
from jax.experimental import pallas as pl
from jax.experimental.pallas import tpu as pltpu


# --------------------------------------------------------------------------
# small helpers
# --------------------------------------------------------------------------
def _round_up(x, m):
    return ((x + m - 1) // m) * m


def _pad_to(arr, target_shape):
    pads = [(0, t - s) for s, t in zip(arr.shape, target_shape)]
    if any(hi for _, hi in pads):
        arr = jnp.pad(arr, pads)
    return arr


def _choose_tile(length, max_tile):
    """Return (tile, padded_length): tile is a multiple of 8 and padded_length
    a multiple of tile.  Long sequences keep the full max_tile (pad + mask
    instead of shrinking to tiny 8-row tiles that starve the MXU)."""
    max_tile = max(8, _round_up(max_tile, 8))
    if length <= max_tile:
        tile = _round_up(length, 8)
        return tile, tile
    return max_tile, _round_up(length, max_tile)


def _physical_vmem_bytes():
    try:
        return int(pltpu.get_tpu_info().vmem_capacity_bytes)
    except Exception:
        return 64 * 1024 * 1024          # v7x-safe fallback


def _vmem_limit_bytes(footprint_bytes):
    cap = (_physical_vmem_bytes() * 3) // 4          # leave compiler headroom
    want = max(32 * 1024 * 1024, 2 * footprint_bytes)
    return int(min(cap, want))


def _chip_has_bf16_eup():
    """v6e / v7x have a bf16 VPU+EUP path; v5e and older do not."""
    try:
        kind = jax.devices()[0].device_kind.lower()
    except Exception:
        return False
    return not any(v in kind for v in ("v2", "v3", "v4", "v5"))


# --------------------------------------------------------------------------
# optional single-buffering of constant weight blocks (probed once)
# --------------------------------------------------------------------------
_SINGLE_BUFFER_OK = None


def _probe_copy_kernel(x_ref, o_ref):
    o_ref[...] = x_ref[...]


def _single_buffer_supported():
    global _SINGLE_BUFFER_OK
    if _SINGLE_BUFFER_OK is not None:
        return _SINGLE_BUFFER_OK
    ok = False
    if hasattr(pl, "Buffered"):
        try:
            spec = pl.BlockSpec((8, 128), lambda i: (0, 0),
                                pipeline_mode=pl.Buffered(1))
            fn = pl.pallas_call(
                _probe_copy_kernel,
                out_shape=jax.ShapeDtypeStruct((8, 128), jnp.float32),
                grid=(1,),
                in_specs=[spec],
                out_specs=pl.BlockSpec((8, 128), lambda i: (0, 0)),
            )
            jax.block_until_ready(fn(jnp.zeros((8, 128), jnp.float32)))
            ok = True
        except Exception:
            ok = False
    _SINGLE_BUFFER_OK = ok
    return ok


def _weight_spec(shape, index_map, single_buffer):
    """BlockSpec for a weight whose index_map is constant across the grid."""
    if single_buffer:
        return pl.BlockSpec(shape, index_map, pipeline_mode=pl.Buffered(1))
    return pl.BlockSpec(shape, index_map)


# --------------------------------------------------------------------------
# kernel 1: fused K/V projection (each kv row tile projected exactly once)
# --------------------------------------------------------------------------
def _project_kv_kernel(xkv_ref, wkv_ref, k_ref, v_ref, *, a_pad):
    """xkv_ref: (1, tk, Din)  wkv_ref: (Din, a_pad + dv_pad)
       k_ref:   (1, tk, a_pad)   v_ref: (1, tk, dv_pad)"""
    kvp = jnp.dot(xkv_ref[0], wkv_ref[...],
                  preferred_element_type=jnp.float32)
    k_ref[0] = kvp[:, :a_pad].astype(k_ref.dtype)
    v_ref[0] = kvp[:, a_pad:].astype(v_ref.dtype)


# --------------------------------------------------------------------------
# kernel 2: flash attention over pre-projected K/V (online softmax)
# --------------------------------------------------------------------------
def _flash_attn_kernel(xq_ref, wq_ref, k_ref, v_ref, o_ref,
                       q_scr, m_scr, l_scr, acc_scr,
                       *, kv_len, kv_tile, mask_kv, exp_dtype):
    """One (batch, q-tile, kv-tile) grid step.

    xq_ref:  (1, tq, Din)      query-side input tile
    wq_ref:  (Din, a_pad)      query weight, pre-scaled by 1/sqrt(dim_attn)
    k_ref:   (1, tk, a_pad)    pre-projected K tile
    v_ref:   (1, tk, dv_pad)   pre-projected V tile
    o_ref:   (1, tq, dv_pad)   output tile (resident across the kv axis)
    q_scr:   (tq, a_pad)       projected Q (MXU-operand dtype)
    m_scr, l_scr: (tq, 1) f32  online-softmax running max / sum
    acc_scr: (tq, dv_pad) f32  running weighted-V accumulator
    """
    ki = pl.program_id(2)

    @pl.when(ki == 0)
    def _init():
        # Q projection once per (batch, q-tile); scale already folded into wq.
        q_scr[...] = jnp.dot(
            xq_ref[0], wq_ref[...], preferred_element_type=jnp.float32
        ).astype(q_scr.dtype)
        m_scr[...] = jnp.full_like(m_scr, -jnp.inf)
        l_scr[...] = jnp.zeros_like(l_scr)
        acc_scr[...] = jnp.zeros_like(acc_scr)

    k = k_ref[0]
    v = v_ref[0]

    # scores = Q K^T (scale folded into wq); contract last axes -> no transpose.
    s = lax.dot_general(
        q_scr[...], k,
        dimension_numbers=(((1,), (1,)), ((), ())),
        preferred_element_type=jnp.float32)            # (tq, tk)

    if mask_kv:
        # Padded kv positions must not contribute to the softmax.
        col = lax.broadcasted_iota(jnp.int32, s.shape, 1) + ki * kv_tile
        s = jnp.where(col < kv_len, s, -jnp.inf)

    # Online softmax update (state kept in f32).
    m_prev = m_scr[...]
    m_new = jnp.maximum(m_prev, jnp.max(s, axis=-1, keepdims=True))
    alpha = jnp.exp(m_prev - m_new)
    # exp in bf16 on chips with a bf16 EUP (doubles transcendental throughput);
    # row sum and l/acc updates stay f32.
    p = jnp.exp((s - m_new).astype(exp_dtype))
    l_scr[...] = alpha * l_scr[...] + jnp.sum(
        p.astype(jnp.float32), axis=-1, keepdims=True)
    acc_scr[...] = alpha * acc_scr[...] + jnp.dot(
        p.astype(v.dtype), v, preferred_element_type=jnp.float32)
    m_scr[...] = m_new

    @pl.when(ki == pl.num_programs(2) - 1)
    def _finalize():
        l = l_scr[...]
        inv = pl.reciprocal(l, approx=True)   # EUP vrcp (free slot)
        inv = inv * (2.0 - l * inv)           # one Newton step -> ~f32 accurate
        o_ref[0] = (acc_scr[...] * inv).astype(o_ref.dtype)


# --------------------------------------------------------------------------
# wrapper
# --------------------------------------------------------------------------
def attention_block(x, wq, wk, wv, kv=None, *,
                    max_q_tile=512, max_kv_tile=256, compute_dtype=None):
    """Pallas implementation of AttentionBlock.forward(x, kv).

    x:  [B, Sq, dim_val]
    kv: [B, Skv, dim_val] or None (self-attention)
    wq, wk: [dim_val, dim_attn]   (pre-transposed torch Linear weights)
    wv:     [dim_val, dim_val]
    compute_dtype: optional MXU-operand dtype (e.g. jnp.bfloat16) for f32
        inputs; softmax state and accumulation always stay f32.
    returns [B, Sq, dim_val] in x.dtype
    """
    self_attn = kv is None
    kv_in = x if self_attn else kv

    B, S, Dv = x.shape
    S_kv = kv_in.shape[1]
    A = wq.shape[1]
    dt = x.dtype
    cdt = jnp.dtype(compute_dtype) if compute_dtype is not None else jnp.dtype(dt)

    # Lane / contraction padding (exact: zero rows/cols contribute nothing).
    a_pad = _round_up(A, 128)       # attention dim (score contraction)
    dv_pad = _round_up(Dv, 128)     # value output dim == dim_val
    din_pad = _round_up(Dv, 128)    # input-feature contraction dim == dim_val

    # Fold the 1/sqrt(dim_attn) score scale into wq.
    scale = 1.0 / math.sqrt(A)
    wq_p = _pad_to(wq.astype(jnp.float32) * scale, (din_pad, a_pad)).astype(cdt)
    wk_p = _pad_to(wk.astype(jnp.float32), (din_pad, a_pad)).astype(cdt)
    wv_p = _pad_to(wv.astype(jnp.float32), (din_pad, dv_pad)).astype(cdt)
    wkv_p = jnp.concatenate([wk_p, wv_p], axis=1)     # (din_pad, a_pad+dv_pad)

    # Tile selection + sequence padding (pad & mask rather than shrink tiles).
    tq, S_pad = _choose_tile(S, max_q_tile)
    tk, S_kv_pad = _choose_tile(S_kv, max_kv_tile)
    nq = S_pad // tq
    # v7x has 2 TensorCores: keep the parallel (B * nq) axis splittable.
    if B == 1 and nq % 2 == 1 and tq % 16 == 0:
        tq //= 2
        nq = S_pad // tq
    nk = S_kv_pad // tk
    mask_kv = S_kv_pad != S_kv

    x_p = _pad_to(x, (B, S_pad, din_pad)).astype(cdt)
    if self_attn and S_kv_pad == S_pad:
        kv_p = x_p                                   # no second padded copy
    else:
        kv_p = _pad_to(kv_in, (B, S_kv_pad, din_pad)).astype(cdt)

    single_buf = _single_buffer_supported()
    csize = jnp.dtype(cdt).itemsize
    osize = jnp.dtype(dt).itemsize
    w_bufs = 1 if single_buf else 2

    # ------------- 1) K/V projection: each kv row tile projected ONCE -------
    proj_fp = (2 * tk * din_pad * csize                       # xkv blocks
               + w_bufs * din_pad * (a_pad + dv_pad) * csize  # [Wk | Wv]
               + 2 * tk * a_pad * csize                       # K out blocks
               + 2 * tk * dv_pad * csize                      # V out blocks
               + tk * (a_pad + dv_pad) * 4)                   # f32 matmul temp

    k_proj, v_proj = pl.pallas_call(
        functools.partial(_project_kv_kernel, a_pad=a_pad),
        out_shape=(jax.ShapeDtypeStruct((B, S_kv_pad, a_pad), cdt),
                   jax.ShapeDtypeStruct((B, S_kv_pad, dv_pad), cdt)),
        grid_spec=pltpu.PrefetchScalarGridSpec(
            num_scalar_prefetch=0,
            grid=(B, nk),
            in_specs=[
                pl.BlockSpec((1, tk, din_pad), lambda b, r: (b, r, 0)),
                _weight_spec((din_pad, a_pad + dv_pad), lambda b, r: (0, 0),
                             single_buf),
            ],
            out_specs=[
                pl.BlockSpec((1, tk, a_pad), lambda b, r: (b, r, 0)),
                pl.BlockSpec((1, tk, dv_pad), lambda b, r: (b, r, 0)),
            ],
        ),
        compiler_params=pltpu.CompilerParams(
            dimension_semantics=("parallel", "parallel"),
            vmem_limit_bytes=_vmem_limit_bytes(proj_fp),
        ),
    )(kv_p, wkv_p)

    # ------------- 2) flash attention over pre-projected K/V ----------------
    exp_dtype = (jnp.bfloat16
                 if (cdt == jnp.bfloat16 and _chip_has_bf16_eup())
                 else jnp.float32)

    attn_fp = (2 * tq * din_pad * csize                 # xq blocks
               + w_bufs * din_pad * a_pad * csize       # wq
               + 2 * tk * a_pad * csize                 # K blocks
               + 2 * tk * dv_pad * csize                # V blocks
               + 2 * tq * dv_pad * osize                # output blocks
               + tq * a_pad * csize                     # q_scr
               + tq * dv_pad * 4 + 2 * tq * 4           # acc, m, l
               + tq * tk * 4)                           # f32 score temp

    kernel = functools.partial(
        _flash_attn_kernel, kv_len=S_kv, kv_tile=tk, mask_kv=mask_kv,
        exp_dtype=exp_dtype)

    out_padded = pl.pallas_call(
        kernel,
        out_shape=jax.ShapeDtypeStruct((B, S_pad, dv_pad), dt),
        grid_spec=pltpu.PrefetchScalarGridSpec(
            num_scalar_prefetch=0,
            grid=(B, nq, nk),
            in_specs=[
                pl.BlockSpec((1, tq, din_pad), lambda b, qi, ki: (b, qi, 0)),
                _weight_spec((din_pad, a_pad), lambda b, qi, ki: (0, 0),
                             single_buf),
                pl.BlockSpec((1, tk, a_pad), lambda b, qi, ki: (b, ki, 0)),
                pl.BlockSpec((1, tk, dv_pad), lambda b, qi, ki: (b, ki, 0)),
            ],
            out_specs=pl.BlockSpec((1, tq, dv_pad),
                                   lambda b, qi, ki: (b, qi, 0)),
            scratch_shapes=[
                pltpu.VMEM((tq, a_pad), cdt),            # projected Q
                pltpu.VMEM((tq, 1), jnp.float32),        # running max m
                pltpu.VMEM((tq, 1), jnp.float32),        # running sum l
                pltpu.VMEM((tq, dv_pad), jnp.float32),   # output accumulator
            ],
        ),
        compiler_params=pltpu.CompilerParams(
            dimension_semantics=("parallel", "parallel", "arbitrary"),
            vmem_limit_bytes=_vmem_limit_bytes(attn_fp),
        ),
    )(x_p, wq_p, k_proj, v_proj)

    return out_padded[:, :S, :Dv]


# --------------------------------------------------------------------------
# reference + params + tests
# --------------------------------------------------------------------------
def init_params(key, dim_val, dim_attn):
    """Deterministic init mimicking nn.Linear(bias=False) kaiming-uniform."""
    kq, kk, kvw = jax.random.split(key, 3)
    bound = 1.0 / math.sqrt(dim_val)
    # stored as [in, out] (transposed relative to torch's [out, in])
    wq = jax.random.uniform(kq, (dim_val, dim_attn), jnp.float32, -bound, bound)
    wk = jax.random.uniform(kk, (dim_val, dim_attn), jnp.float32, -bound, bound)
    wv = jax.random.uniform(kvw, (dim_val, dim_val), jnp.float32, -bound, bound)
    return wq, wk, wv


def _reference(x, wq, wk, wv, kv=None):
    if kv is None:
        kv = x
    q = x @ wq
    k = kv @ wk
    v = kv @ wv
    scores = jnp.einsum("bqa,bka->bqk", q, k) / jnp.sqrt(
        jnp.float32(wq.shape[1]))
    return jax.nn.softmax(scores, axis=-1) @ v


if __name__ == "__main__":
    # Small shapes consistent with the module: batch=2, seq=8, dim_val=32,
    # dim_attn=16.
    B, S, dim_val, dim_attn = 2, 8, 32, 16

    key = jax.random.PRNGKey(0)
    kx, kkv, kx2, kx3, kp = jax.random.split(key, 5)
    x = jax.random.normal(kx, (B, S, dim_val), dtype=jnp.float32)
    wq, wk, wv = init_params(kp, dim_val, dim_attn)

    # 1) self-attention, f32
    out = jax.block_until_ready(attention_block(x, wq, wk, wv))
    ref = _reference(x, wq, wk, wv)
    assert out.shape == (B, S, dim_val)
    assert jnp.allclose(out, ref, atol=1e-5, rtol=1e-5)

    # 2) cross-attention (kv != x, different sequence length), f32
    kv_in = jax.random.normal(kkv, (B, 2 * S, dim_val), dtype=jnp.float32)
    out_x = jax.block_until_ready(attention_block(x, wq, wk, wv, kv=kv_in))
    ref_x = _reference(x, wq, wk, wv, kv=kv_in)
    assert out_x.shape == (B, S, dim_val)
    assert jnp.allclose(out_x, ref_x, atol=1e-5, rtol=1e-5)

    # 3) multi q-tile / kv-tile path: exercises the online-softmax accumulation
    S2 = 32
    x2 = jax.random.normal(kx2, (B, S2, dim_val), dtype=jnp.float32)
    out2 = jax.block_until_ready(
        attention_block(x2, wq, wk, wv, max_q_tile=16, max_kv_tile=8))
    ref2 = _reference(x2, wq, wk, wv)
    assert jnp.allclose(out2, ref2, atol=1e-5, rtol=1e-5)

    # 4) ragged sequence: exercises seq padding + kv -inf masking
    S3 = 40
    x3 = jax.random.normal(kx3, (B, S3, dim_val), dtype=jnp.float32)
    out3 = jax.block_until_ready(
        attention_block(x3, wq, wk, wv, max_q_tile=16, max_kv_tile=16))
    ref3 = _reference(x3, wq, wk, wv)
    assert out3.shape == (B, S3, dim_val)
    assert jnp.allclose(out3, ref3, atol=1e-5, rtol=1e-5)

    # 5) ragged cross-attention (S and S_kv not multiples of 8)
    x5 = x3[:, :5]
    kv5 = jax.random.normal(kkv, (B, 13, dim_val), dtype=jnp.float32)
    out5 = jax.block_until_ready(attention_block(x5, wq, wk, wv, kv=kv5))
    ref5 = _reference(x5, wq, wk, wv, kv=kv5)
    assert jnp.allclose(out5, ref5, atol=1e-5, rtol=1e-5)

    # 6) bf16 MXU-operand path (f32 accumulation / softmax), loose tolerance
    out_bf = jax.block_until_ready(
        attention_block(x.astype(jnp.bfloat16), wq, wk, wv))
    assert jnp.allclose(out_bf.astype(jnp.float32), ref, atol=1e-1, rtol=1e-1)

    # 7) f32 inputs with the flag-guarded bf16 MXU-operand fast path
    out_cd = jax.block_until_ready(
        attention_block(x, wq, wk, wv, compute_dtype=jnp.bfloat16))
    assert jnp.allclose(out_cd, ref, atol=1e-1, rtol=1e-1)

    print("KERNEL_OK")
</pallas_src>

<mosaic_0001>
module attributes {stable_mosaic.version = 11 : i64} {
  func.func @_probe_copy_kernel(%arg0: i32, %arg1: memref<8x128xf32, #tpu.memory_space<vmem>>, %arg2: memref<8x128xf32, #tpu.memory_space<vmem>>) attributes {dimension_semantics = [#tpu.dimension_semantics<arbitrary>], iteration_bounds = array<i64: 1>, scalar_prefetch = 0 : i64, scratch_operands = 0 : i64, tpu.core_type = #tpu.core_type<tc>, window_params = [{pipeline_mode = #tpu.pipeline_mode<synchronous>, transform_indices = @transform_0, window_bounds = array<i64: 8, 128>}, {pipeline_mode = #tpu.pipeline_mode<synchronous>, transform_indices = @transform_1, window_bounds = array<i64: 8, 128>}]} {
    %c0 = arith.constant 0 : index
    %c0_0 = arith.constant 0 : index
    %0 = vector.load %arg1[%c0, %c0_0] : memref<8x128xf32, #tpu.memory_space<vmem>>, vector<8x128xf32>
    %c0_1 = arith.constant 0 : index
    %c0_2 = arith.constant 0 : index
    %1 = vector.load %arg2[%c0_1, %c0_2] : memref<8x128xf32, #tpu.memory_space<vmem>>, vector<8x128xf32>
    tpu.vector_store %arg2[%c0_1, %c0_2], %0 {strides = array<i32>} : memref<8x128xf32, #tpu.memory_space<vmem>>, vector<8x128xf32>,
    return
  }
  func.func @transform_0(%arg0: i32) -> (i32, i32) {
    %c0_i32 = arith.constant 0 : i32
    %c0_i32_0 = arith.constant 0 : i32
    %c0_i32_1 = arith.constant 0 : i32
    return %c0_i32, %c0_i32_0 : i32, i32
  }
  func.func @transform_1(%arg0: i32) -> (i32, i32) {
    %c0_i32 = arith.constant 0 : i32
    %c0_i32_0 = arith.constant 0 : i32
    %c0_i32_1 = arith.constant 0 : i32
    return %c0_i32, %c0_i32_0 : i32, i32
  }
}

module attributes {stable_mosaic.version = 11 : i64} {
  func.func @_project_kv_kernel(%arg0: i32, %arg1: i32, %arg2: memref<1x8x128xf32, #tpu.memory_space<vmem>>, %arg3: memref<128x256xf32, #tpu.memory_space<vmem>>, %arg4: memref<1x8x128xf32, #tpu.memory_space<vmem>>, %arg5: memref<1x8x128xf32, #tpu.memory_space<vmem>>) attributes {dimension_semantics = [#tpu.dimension_semantics<parallel>, #tpu.dimension_semantics<parallel>], iteration_bounds = array<i64: 2, 1>, scalar_prefetch = 0 : i64, scratch_operands = 0 : i64, tpu.core_type = #tpu.core_type<tc>, window_params = [{transform_indices = @transform_0, window_bounds = array<i64: 1, 8, 128>}, {pipeline_mode = #tpu.pipeline_mode<synchronous>, transform_indices = @transform_1, window_bounds = array<i64: 128, 256>}, {transform_indices = @transform_2, window_bounds = array<i64: 1, 8, 128>}, {transform_indices = @transform_3, window_bounds = array<i64: 1, 8, 128>}]} {
    %c0 = arith.constant 0 : index
    %c0_0 = arith.constant 0 : index
    %c0_1 = arith.constant 0 : index
    %0 = vector.load %arg2[%c0, %c0_0, %c0_1] : memref<1x8x128xf32, #tpu.memory_space<vmem>>, vector<1x8x128xf32>
    %1 = vector.shape_cast %0 : vector<1x8x128xf32> to vector<8x128xf32>
    %c0_2 = arith.constant 0 : index
    %c0_3 = arith.constant 0 : index
    %2 = vector.load %arg3[%c0_2, %c0_3] : memref<128x256xf32, #tpu.memory_space<vmem>>, vector<128x256xf32>
    %cst = arith.constant dense<0.000000e+00> : vector<8x256xf32>
    %3 = tpu.matmul %1, %2, %cst {dimension_numbers = #tpu.dot_dimension_numbers<[1], [0], [0], [1], [0, 0, 1, 1], [], []>} : vector<8x128xf32>, vector<128x256xf32>, vector<8x256xf32> -> vector<8x256xf32>
    %4 = vector.extract_strided_slice %3 {offsets = [0, 0], sizes = [8, 128], strides = [1, 1]} : vector<8x256xf32> to vector<8x128xf32>
    %c0_4 = arith.constant 0 : index
    %c0_5 = arith.constant 0 : index
    %c0_6 = arith.constant 0 : index
    %5 = vector.load %arg4[%c0_4, %c0_5, %c0_6] : memref<1x8x128xf32, #tpu.memory_space<vmem>>, vector<1x8x128xf32>
    %6 = vector.shape_cast %5 : vector<1x8x128xf32> to vector<8x128xf32>
    %7 = vector.shape_cast %4 : vector<8x128xf32> to vector<1x8x128xf32>
    tpu.vector_store %arg4[%c0_4, %c0_5, %c0_6], %7 {strides = array<i32>} : memref<1x8x128xf32, #tpu.memory_space<vmem>>, vector<1x8x128xf32>,
    %8 = vector.extract_strided_slice %3 {offsets = [0, 128], sizes = [8, 128], strides = [1, 1]} : vector<8x256xf32> to vector<8x128xf32>
    %c0_7 = arith.constant 0 : index
    %c0_8 = arith.constant 0 : index
    %c0_9 = arith.constant 0 : index
    %9 = vector.load %arg5[%c0_7, %c0_8, %c0_9] : memref<1x8x128xf32, #tpu.memory_space<vmem>>, vector<1x8x128xf32>
    %10 = vector.shape_cast %9 : vector<1x8x128xf32> to vector<8x128xf32>
    %11 = vector.shape_cast %8 : vector<8x128xf32> to vector<1x8x128xf32>
    tpu.vector_store %arg5[%c0_7, %c0_8, %c0_9], %11 {strides = array<i32>} : memref<1x8x128xf32, #tpu.memory_space<vmem>>, vector<1x8x128xf32>,
    return
  }
  func.func @transform_0(%arg0: i32, %arg1: i32) -> (i32, i32, i32) {
    %c0_i32 = arith.constant 0 : i32
    %c0_i32_0 = arith.constant 0 : i32
    return %arg0, %arg1, %c0_i32 : i32, i32, i32
  }
  func.func @transform_1(%arg0: i32, %arg1: i32) -> (i32, i32) {
    %c0_i32 = arith.constant 0 : i32
    %c0_i32_0 = arith.constant 0 : i32
    %c0_i32_1 = arith.constant 0 : i32
    return %c0_i32, %c0_i32_0 : i32, i32
  }
  func.func @transform_2(%arg0: i32, %arg1: i32) -> (i32, i32, i32) {
    %c0_i32 = arith.constant 0 : i32
    %c0_i32_0 = arith.constant 0 : i32
    return %arg0, %arg1, %c0_i32 : i32, i32, i32
  }
  func.func @transform_3(%arg0: i32, %arg1: i32) -> (i32, i32, i32) {
    %c0_i32 = arith.constant 0 : i32
    %c0_i32_0 = arith.constant 0 : i32
    return %arg0, %arg1, %c0_i32 : i32, i32, i32
  }
}

</mosaic_0001>

<bundles_post_ra>
// kernel: tpu_custom_call.1
= control target key start
LH: loop header
LB: loop body
LE: loop exit
PB: predicated region body
PF: predicated region fallthrough
CT: control target
= control target key end

     0   :  { %6 = vsyncpa [#allocation3], 0  ;;  %s102_s0 = inlined_call_operand.hbm [shape: f32[8,128], index: 0, kind: input, shape index: {}]   ;;  %s103_s1 = inlined_call_operand.hbm [shape: f32[8,128], index: 1, kind: output, shape index: {}]  }
   0x1   :  { %7 = vsyncpa [#allocation4], 0  ;;  %s84_s6 = smov [#allocation2]  }
   0x2   :  { %s14_s7 = sshll.u32 %s84_s6, 4  ;;  %s15_s7 = int_to_ptr.vmem [resolvable:$true] %s14_s7 }
   0x3   :  { %s48_s8 = scalar_lea.vmem %s15_s7, 128  ;;  %p53_p1 = scmp.lt.s32.totalorder %s15_s7, %s15_s7 }
   0x4   :  { %p49_p0 = scmp.ne.s32.totalorder %s15_s7, %s48_s8  ;;  %p54_p2 = scmp.lt.s32.totalorder %s48_s8, %s48_s8 }
   0x6   :  { %p55_p3 = por %p54_p2, %p53_p1 }
   0x8   :  { %p56_p4 = pnand %p55_p3, %p49_p0 }
   0xa   :  { %59 = shalt.err (!%p56_p4)
}
   0xb   :  { %17 = dma.hbm_to_vmem [thread:$0]  %s102_s0, 128, %s15_s7, [#allocation3]  }
   0xc   :  { %80 = dma.done.wait [#allocation3], 128  }
   0xd   :  { %81 = vsyncadd [#allocation3], 4294967168  ;;  %s85_s11 = smov [#allocation5]   ;;  %v21_v0 = vld [vmem:[#allocation2] sm:$0xff] }
   0xe   :  { %s29_s12 = sshll.u32 %s85_s11, 4  ;;  %22 = vst [vmem:[#allocation5] sm:$0xff] %v21_v0  ;;  %s30_s12 = int_to_ptr.vmem [resolvable:$true] %s29_s12 }
   0xf   :  { %s60_s13 = scalar_lea.vmem %s30_s12, 128  ;;  %p65_p6 = scmp.lt.s32.totalorder %s30_s12, %s30_s12 }
  0x10   :  { %p61_p5 = scmp.ne.s32.totalorder %s30_s12, %s60_s13  ;;  %p66_p7 = scmp.lt.s32.totalorder %s60_s13, %s60_s13 }
  0x12   :  { %p67_p8 = por %p66_p7, %p65_p6 }
  0x14   :  { %p68_p9 = pnand %p67_p8, %p61_p5 }
  0x16   :  { %71 = shalt.err (!%p68_p9)
}
  0x17   :  { %32 = dma.vmem_to_hbm [thread:$0]  %s30_s12, 128, %s103_s1, [#allocation4]  }
  0x18   :  { %82 = dma.done.wait [#allocation4], 128  }
  0x19   :  { %83 = vsyncadd [#allocation4], 4294967168 }
  0x1a   :  { %36 = vsyncpa [#allocation3], 1 }
  0x1b   :  { %37 = vsyncpa [#allocation4], 1 }

// kernel: tpu_custom_call.1
= control target key start
LH: loop header
LB: loop body
LE: loop exit
PB: predicated region body
PF: predicated region fallthrough
CT: control target
= control target key end

     0   :  { %9 = vsyncpa [#allocation3], 0  ;;  %s1008_s0 = inlined_call_operand.hbm [shape: f32[2,8,128], index: 0, kind: input, shape index: {}]   ;;  %s1009_s1 = inlined_call_operand.hbm [shape: f32[128,256], index: 1, kind: input, shape index: {}]   ;;  %s1010_s2 = inlined_call_operand.hbm [shape: f32[2,8,128], index: 2, kind: output, shape index: {0}]   ;;  %s1011_s3 = inlined_call_operand.hbm [shape: f32[2,8,128], index: 3, kind: output, shape index: {1}]  }
   0x1   :  { %11 = vsyncpa [#allocation3 + $0x1], 0 }
   0x2   :  { %12 = vsyncpa [#allocation6], 0 }
   0x3   :  { %13 = vsyncpa [#allocation4], 0 }
   0x4   :  { %15 = vsyncpa [#allocation4 + $0x1], 0 }
   0x5   :  { %16 = vsyncpa [#allocation9], 0 }
   0x6   :  { %18 = vsyncpa [#allocation9 + $0x1], 0  ;;  %s790_s12 = smov 0   ;;  %s792_s13 = smov 0  }
   0x7   :  { %s794_s14 = smov 0   ;;  %s796_s15 = smov 0  }
   0x8   :  { %s798_s16 = smov 0   ;;  %s800_s17 = smov 0  }
   0x9 LB: > { %s494_s18 = sadd.s32 4294967295, %s761_s17   ;;  %s495_s19 = sadd.s32 4294967294, %s761_s17   ;;  %s761_s17 = sphi %s800_s17, %s24_s17   ;;  %s757_s16 = sphi %s798_s16, %s1029_s16   ;;  %s753_s15 = sphi %s796_s15, %s1028_s15   ;;  %s749_s14 = sphi %s794_s14, %s1027_s14   ;;  %s745_s13 = sphi %s792_s13, %s1026_s13   ;;  %s741_s12 = sphi %s790_s12, %s1025_s12  }
   0xa   : > { %p58_p0 = scmp.ne.s32.totalorder %s745_s13, %s741_s12  ;;  %p824_p1 = scmp.eq.s32.totalorder %s494_s18, 0 }
   0xb   : > { %p828_p2 = scmp.eq.s32.totalorder %s494_s18, 1  ;;  %p111_p3 = scmp.eq.s32.totalorder %s495_s19, 1 }
   0xc   : > { %p834_p4 = por %p824_p1, %p58_p0  ;;  %p496_p5 = scmp.ge.s32.totalorder %s761_s17, 1 }
   0xd   : > { %p839_p6 = por %p111_p3, %p58_p0  ;;  %p146_p7 = scmp.lt.s32.totalorder %s761_s17, 3 }
   0xe   : > { %s1015_s22 = scalar_select %p834_p4, 1, 0 }
   0xf   : > { %s1016_s23 = scalar_select %p839_p6, 1, 0 }
  0x10   : > { %p844_p8 = pnand %p496_p5, %p146_p7  ;;  %s763_s25 = smov [#allocation5]  }
  0x11   : > { %s158_s26 = sshll.u32 %s763_s25, 4  ;;  %s36_s28 = sadd.s32 1, %s757_s16  ;;  %s159_s26 = int_to_ptr.vmem [resolvable:$true] %s158_s26 }
  0x12   : > { %p522_p9 = pneg %p844_p8  ;;  %s604_s29 = scalar_lea.vmem %s159_s26, 4096 }
  0x13   : > { %p605_p13 = scmp.ne.s32.totalorder %s159_s26, %s604_s29  ;;  %p612_p5 = scmp.lt.s32.totalorder %s159_s26, %s159_s26 }
  0x14   : > { %p853_p11 = pnand %p522_p9, %p824_p1  ;;  %p613_p7 = scmp.lt.s32.totalorder %s604_s29, %s604_s29 }
  0x16   : > { %p595_p12 = pneg %p853_p11  ;;  %p614_p6 = por %p613_p7, %p612_p5 }
  0x18   : > { %p607_p0 = pnand %p605_p13, %p595_p12 }
  0x1a   : > { %p608_p3 = pneg %p607_p0 }
  0x1c   : > { %p615_p4 = pnand %p614_p6, %p608_p3 }
  0x1e   : > { %618 = shalt.err (!%p615_p4)
}
  0x1f   : > { %s764_s30 = smov 256   ;;  %s765_s4 = smov 16  }
  0x20   : > { %525 = dma.hbm_to_vmem [thread:$0]  (!%p853_p11), %s1009_s1, 4096, %s159_s26, [#allocation6], %s764_s30, %s764_s30, %s765_s4  }
  0x21   : > { %p38_p6 = scmp.ge.s32.totalorder %s36_s28, 2  ;;  %s45_s7 = sadd.s32 1, %s749_s14 }
  0x22   : > { %p52_p4 = scmp.ne.s32.totalorder %s749_s14, %s745_s13  ;;  %p53_p9 = scmp.eq.s32.totalorder %s761_s17, 0 }
  0x23   : > { %s1031_s28 = smov (%p38_p6, %s36_s28), 0  ;;  %p538_p0 = scmp.lt.s32.totalorder %s761_s17, 2 }
  0x24   : > { %p871_p12 = por %p53_p9, %p52_p4  ;;  %p877_p13 = por %p828_p2, %p52_p4 }
  0x25   : > { %s40_s10 = ssub.s32 %s757_s16, %s1031_s28  ;;  %s172_s11 = sand.u32 1, %s749_s14  }
  0x26   : > { %p43_p11 = scmp.eq.s32.totalorder %s40_s10, 0  ;;  %s499_s18 = sshll.u32 %s172_s11, 3 }
  0x27   : > { %s500_s25 = sshll.u32 %s757_s16, 7  ;;  %s176_s30 = scalar_lea.vmem [#allocation2], %s499_s18 }
  0x28   : > { %s886_s19 = scalar_select %p43_p11, %s749_s14, %s45_s7  }
  0x29   : > { %s182_s29 = scalar_lea.hbm %s1008_s0, %s500_s25  ;;  %s184_s4 = sshll.u32 %s176_s30, 4  ;;  %s185_s4 = int_to_ptr.vmem [resolvable:$true] %s184_s4 }
  0x2a   : > { %p894_p2 = pnand %p538_p0, %p871_p12  ;;  %s173_s5 = scalar_lea.sflag [#allocation3], %s172_s11 }
  0x2b   : > { %s632_s6 = scalar_lea.vmem %s185_s4, 128  ;;  %s766_s7 = smov [#allocation2]  }
  0x2c   : > { %p621_p3 = pneg %p894_p2  ;;  %p633_p5 = scmp.ne.s32.totalorder %s185_s4, %s632_s6 }
  0x2d   : > { %s637_s10 = sshll.u32 %s766_s7, 4  ;;  %s638_s10 = int_to_ptr.vmem [resolvable:$false] %s637_s10 }
  0x2e   : > { %p635_p7 = pnand %p633_p5, %p621_p3  ;;  %s639_s25 = scalar_lea.vmem %s638_s10, 256 }
  0x2f   : > { %p640_p4 = scmp.lt.s32.totalorder %s185_s4, %s638_s10  ;;  %p641_p9 = scmp.lt.s32.totalorder %s639_s25, %s632_s6 }
  0x30   : > { %p636_p6 = pneg %p635_p7 }
  0x31   : > { %p642_p11 = por %p641_p9, %p640_p4 }
  0x33   : > { %p643_p10 = pnand %p642_p11, %p636_p6 }
  0x35   : > { %646 = shalt.err (!%p643_p10)
}
  0x36   : > { %529 = dma.hbm_to_vmem [thread:$0]  (!%p894_p2), %s182_s29, 128, %s185_s4, %s173_s5  }
  0x37   : > { %193 = sbr.rel (%p844_p8) target bundleno = 325 (0x145), region = 28  ;;  %s905_s8 = sand.u32 (!%p844_p8), 1, %s745_s13  }
  0x38   : > { %s908_s11 = sshll.u32 (!%p844_p8), %s905_s8, 3  ;;  %s196_s18 = scalar_lea.sflag (!%p844_p8), [#allocation3], %s905_s8 }
  0x39   : > { %s199_s26 = scalar_lea.vmem (!%p844_p8), [#allocation2], %s908_s11  ;;  %p1022_p12 = scmp.ne.s32.totalorder (!%p844_p8), %s1015_s22, 0 }
  0x3c   : > { %724 = dma.done.wait (%p1022_p12), %s196_s18, 128  }
  0x3d   : > { %726 = vsyncadd (%p1022_p12), %s196_s18, 4294967168 }
  0x3e   : > { %728 = dma.done.wait (%p824_p1), [#allocation6], 4096  }
  0x3f   : > { %730 = vsyncadd (%p824_p1), [#allocation6], 4294963200  ;;  %v767_v0 = vmov 0.0   ;;  %v263_v1 = vld [vmem:[#allocation5 + $0xf8] sm:$0xff]  ;;  %v262_v2 = vld [vmem:[#allocation5 + $0xf0] sm:$0xff]  ;;  %s223_s20 = scalar_lea.vmem [#allocation7], %s908_s11 }
  0x40   : > { %328 = vmatprep.mubr.f32.mxu0 %v767_v0  ;;  %v261_v3 = vld [vmem:[#allocation5 + $0xe8] sm:$0xff]  ;;  %264 = vmatprep.subr.mxu0 %v263_v1  ;;  %v260_v4 = vld [vmem:[#allocation5 + $0xe0] sm:$0xff]  ;;  %v259_v5 = vld [vmem:[#allocation5 + $0xd8] sm:$0xff]  ;;  %s357_s22 = sshll.u32 %s223_s20, 4  ;;  %s508_s24 = sshll.u32 %s753_s15, 7  ;;  %s927_s22 = int_to_ptr.vmem [resolvable:$true] %s357_s22 }
  0x41   : > { %265 = vmatpush1.msra.mxu0 %v262_v2  ;;  %v258_v6 = vld [vmem:[#allocation5 + $0xd0] sm:$0xff]  ;;  %v257_v7 = vld [vmem:[#allocation5 + $0xc8] sm:$0xff]  ;;  %v256_v8 = vld [vmem:[#allocation5 + $0xc0] sm:$0xff]  ;;  %s230_s27 = scalar_lea.vmem [#allocation8], %s908_s11  ;;  %s932_s21 = scalar_lea.hbm %s1010_s2, %s508_s24 }
  0x42   : > { %266 = vmatprep.subr.mxu0 %v261_v3  ;;  %v255_v9 = vld [vmem:[#allocation5 + $0xb8] sm:$0xff]  ;;  %v254_v10 = vld [vmem:[#allocation5 + $0xb0] sm:$0xff]  ;;  %v253_v11 = vld [vmem:[#allocation5 + $0xa8] sm:$0xff]  ;;  %s371_s29 = sshll.u32 %s230_s27, 4  ;;  %s939_s15 = scalar_lea.hbm %s1011_s3, %s508_s24  ;;  %s934_s29 = int_to_ptr.vmem [resolvable:$true] %s371_s29 }
  0x43   : > { %267 = vmatpush1.msra.mxu0 %v260_v4  ;;  %v252_v12 = vld [vmem:[#allocation5 + $0xa0] sm:$0xff]  ;;  %v251_v13 = vld [vmem:[#allocation5 + $0x98] sm:$0xff]  ;;  %v250_v14 = vld [vmem:[#allocation5 + $0x90] sm:$0xff]  ;;  %s338_s7 = scalar_lea.sflag [#allocation4], %s905_s8  ;;  %s647_s10 = scalar_lea.vmem %s927_s22, 128 }
  0x44   : > { %268 = vmatprep.subr.mxu0 %v259_v5  ;;  %v249_v15 = vld [vmem:[#allocation5 + $0x88] sm:$0xff]  ;;  %v248_v16 = vld [vmem:[#allocation5 + $0x80] sm:$0xff]  ;;  %v247_v17 = vld [vmem:[#allocation5 + $0x78] sm:$0xff]  ;;  %p648_p1 = scmp.ne.s32.totalorder %s927_s22, %s647_s10  ;;  %s768_s25 = smov [#allocation7]  }
  0x45   : > { %269 = vmatpush1.msra.mxu0 %v258_v6  ;;  %v246_v18 = vld [vmem:[#allocation5 + $0x70] sm:$0xff]  ;;  %v245_v19 = vld [vmem:[#allocation5 + $0x68] sm:$0xff]  ;;  %v244_v20 = vld [vmem:[#allocation5 + $0x60] sm:$0xff]  ;;  %s651_s18 = sshll.u32 %s768_s25, 4  ;;  %s652_s18 = int_to_ptr.vmem [resolvable:$false] %s651_s18 }
  0x46   : > { %270 = vmatprep.subr.mxu0 %v257_v7  ;;  %v243_v21 = vld [vmem:[#allocation5 + $0x58] sm:$0xff]  ;;  %v242_v22 = vld [vmem:[#allocation5 + $0x50] sm:$0xff]  ;;  %v241_v23 = vld [vmem:[#allocation5 + $0x48] sm:$0xff]  ;;  %p649_p8 = pnand %p648_p1, %p877_p13  ;;  %p654_p0 = scmp.lt.s32.totalorder %s927_s22, %s652_s18 }
  0x47   : > { %271 = vmatpush1.msra.mxu0 %v256_v8  ;;  %v240_v24 = vld [vmem:[#allocation5 + $0x40] sm:$0xff]  ;;  %v239_v25 = vld [vmem:[#allocation5 + $0x38] sm:$0xff]  ;;  %v238_v26 = vld [vmem:[#allocation5 + $0x30] sm:$0xff] }
  0x48   : > { %272 = vmatprep.subr.mxu0 %v255_v9  ;;  %v237_v27 = vld [vmem:[#allocation5 + $0x28] sm:$0xff]  ;;  %v236_v28 = vld [vmem:[#allocation5 + $0x20] sm:$0xff]  ;;  %v235_v29 = vld [vmem:[#allocation5 + $0x18] sm:$0xff]  ;;  %p650_p10 = pneg %p649_p8 }
  0x49   : > { %273 = vmatpush1.msra.mxu0 %v254_v10  ;;  %v234_v30 = vld [vmem:[#allocation5 + $0x10] sm:$0xff]  ;;  %v233_v31 = vld [vmem:[#allocation5 + $0x8] sm:$0xff]  ;;  %v232_v32 = vld [vmem:[#allocation5] sm:$0xff] }
  0x4a   : > { %274 = vmatprep.subr.mxu0 %v253_v11  ;;  %v231_v33 = vld [vmem:[%s199_s26] sm:$0xff]  ;;  %s653_s26 = scalar_lea.vmem %s652_s18, 256 }
  0x4b   : > { %275 = vmatpush1.msra.mxu0 %v252_v12  ;;  %p655_p2 = scmp.lt.s32.totalorder %s653_s26, %s647_s10 }
  0x4c   : > { %276 = vmatprep.subr.mxu0 %v251_v13 }
  0x4d   : > { %277 = vmatpush1.msra.mxu0 %v250_v14  ;;  %p656_p3 = por %p655_p2, %p654_p0 }
  0x4e   : > { %278 = vmatprep.subr.mxu0 %v249_v15 }
  0x4f   : > { %279 = vmatpush1.msra.mxu0 %v248_v16  ;;  %p657_p5 = pnand %p656_p3, %p650_p10 }
  0x50   : > { %280 = vmatprep.subr.mxu0 %v247_v17 }
  0x51   : > { %281 = vmatpush1.msra.mxu0 %v246_v18 }
  0x52   : > { %282 = vmatprep.subr.mxu0 %v245_v19 }
  0x53   : > { %283 = vmatpush1.msra.mxu0 %v244_v20 }
  0x54   : > { %284 = vmatprep.subr.mxu0 %v243_v21 }
  0x55   : > { %285 = vmatpush1.msra.mxu0 %v242_v22 }
  0x56   : > { %286 = vmatprep.subr.mxu0 %v241_v23 }
  0x57   : > { %287 = vmatpush1.msra.mxu0 %v240_v24 }
  0x58   : > { %288 = vmatprep.subr.mxu0 %v239_v25 }
  0x59   : > { %289 = vmatpush1.msra.mxu0 %v238_v26 }
  0x5a   : > { %290 = vmatprep.subr.mxu0 %v237_v27 }
  0x5b   : > { %291 = vmatpush1.msra.mxu0 %v236_v28 }
  0x5c   : > { %292 = vmatprep.subr.mxu0 %v235_v29 }
  0x5d   : > { %293 = vmatpush1.msra.mxu0 %v234_v30 }
  0x5e   : > { %294 = vmatprep.subr.mxu0 %v233_v31 }
  0x5f   : > { %295 = vmatpush1.msra.mxu0 %v232_v32 }
  0x60   : > { %329 = vmatmul.mubr.f32.vlgmr.msra.gmra.mxu0 %v231_v33 }
 0x120   : > { %v330_v34 = vpop.f32.mrf.mxu0 }
 0x121   : > { %335 = vst [vmem:[%s223_s20] sm:$0xff] %v330_v34 }
 0x122   : > { %v332_v35 = vpop.f32.mrf.mxu0 }
 0x123   : > { %660 = shalt.err (!%p657_p5)
}
 0x124   : > { %s661_s20 = scalar_lea.hbm %s932_s21, 128  ;;  %s665_s4 = scalar_lea.hbm %s1010_s2, 256 }
 0x125   : > { %p662_p7 = scmp.ne.s32.totalorder %s932_s21, %s661_s20  ;;  %p666_p9 = scmp.lt.s32.totalorder %s932_s21, %s1010_s2 }
 0x126   : > { %p667_p11 = scmp.lt.s32.totalorder %s665_s4, %s661_s20 }
 0x127   : > { %p663_p6 = pnand %p662_p7, %p877_p13 }
 0x128   : > { %p668_p12 = por %p667_p11, %p666_p9 }
 0x129   : > { %p664_p4 = pneg %p663_p6 }
 0x12b   : > { %p669_p1 = pnand %p668_p12, %p664_p4 }
 0x12d   : > { %672 = shalt.err (!%p669_p1)
}
 0x12e   : > { %518 = dma.vmem_to_hbm [thread:$0]  (%p877_p13), %s927_s22, 128, %s932_s21, %s338_s7   ;;  %336 = vst [vmem:[%s230_s27] sm:$0xff] %v332_v35 }
 0x12f   : > { %s343_s10 = scalar_lea.sflag [#allocation9], %s905_s8  ;;  %s673_s25 = scalar_lea.vmem %s934_s29, 128 }
 0x130   : > { %p674_p8 = scmp.ne.s32.totalorder %s934_s29, %s673_s25  ;;  %s769_s18 = smov [#allocation8]  }
 0x131   : > { %s677_s26 = sshll.u32 %s769_s18, 4  ;;  %s678_s26 = int_to_ptr.vmem [resolvable:$false] %s677_s26 }
 0x132   : > { %p675_p10 = pnand %p674_p8, %p877_p13  ;;  %s679_s20 = scalar_lea.vmem %s678_s26, 256 }
 0x133   : > { %p680_p2 = scmp.lt.s32.totalorder %s934_s29, %s678_s26  ;;  %p681_p3 = scmp.lt.s32.totalorder %s679_s20, %s673_s25 }
 0x134   : > { %p676_p0 = pneg %p675_p10 }
 0x135   : > { %p682_p5 = por %p681_p3, %p680_p2 }
 0x137   : > { %p683_p7 = pnand %p682_p5, %p676_p0 }
 0x139   : > { %686 = shalt.err (!%p683_p7)
}
 0x13a   : > { %s687_s11 = scalar_lea.hbm %s939_s15, 128  ;;  %s691_s27 = scalar_lea.hbm %s1011_s3, 256 }
 0x13b   : > { %p688_p6 = scmp.ne.s32.totalorder %s939_s15, %s687_s11  ;;  %p692_p11 = scmp.lt.s32.totalorder %s939_s15, %s1011_s3 }
 0x13c   : > { %p693_p12 = scmp.lt.s32.totalorder %s691_s27, %s687_s11 }
 0x13d   : > { %p689_p4 = pnand %p688_p6, %p877_p13 }
 0x13e   : > { %p694_p1 = por %p693_p12, %p692_p11 }
 0x13f   : > { %p690_p9 = pneg %p689_p4 }
 0x141   : > { %p695_p8 = pnand %p694_p1, %p690_p9 }
 0x143   : > { %698 = shalt.err (!%p695_p8)
}
 0x144   : > { %519 = dma.vmem_to_hbm [thread:$0]  (%p877_p13), %s934_s29, 128, %s939_s15, %s343_s10  }
 0x145 PF: > { %s383_s24 = sand.u32 1, %s741_s12   ;;  %p1023_p10 = scmp.ne.s32.totalorder %s1016_s23, 0 }
 0x146   : > { %p1024_p0 = scmp.ge.s32.totalorder %s761_s17, 2  ;;  %s384_s30 = scalar_lea.sflag [#allocation4], %s383_s24 }
 0x148   : > { %p531_p2 = pnand %p1024_p0, %p1023_p10 }
 0x14a   : > { %p532_p3 = pneg %p531_p2 }
 0x14c   : > { %732 = dma.done.wait (%p532_p3), %s384_s30, 128  }
 0x14d   : > { %734 = vsyncadd (%p532_p3), %s384_s30, 4294967168  ;;  %s393_s4 = scalar_lea.sflag [#allocation9], %s383_s24 }
 0x14e   : > { %736 = dma.done.wait (%p532_p3), %s393_s4, 128  }
 0x14f   : > { %738 = vsyncadd (%p532_p3), %s393_s4, 4294967168  ;;  %s24_s17 = sadd.s32 1, %s761_s17   ;;  %s1025_s12 = smov %s745_s13 }
 0x150   : > { %p21_p5 = scmp.ge.s32.totalorder %s24_s17, 4   ;;  %s1026_s13 = smov %s749_s14 }
 0x151   : > { %s1027_s14 = smov %s886_s19  ;;  %s1028_s15 = smov %s757_s16 }
 0x152   : > { %s1029_s16 = smov %s1031_s28  ;;  %23 = sbr.rel (!%p21_p5) target bundleno = 9 (0x9), region = 94 }
 0x157   :  { %398 = vsyncpa [#allocation3], 1 }
 0x158   :  { %400 = vsyncpa [#allocation3 + $0x1], 1 }
 0x159   :  { %401 = vsyncpa [#allocation6], 1 }
 0x15a   :  { %402 = vsyncpa [#allocation4], 1 }
 0x15b   :  { %404 = vsyncpa [#allocation4 + $0x1], 1 }
 0x15c   :  { %405 = vsyncpa [#allocation9], 1 }
 0x15d   :  { %407 = vsyncpa [#allocation9 + $0x1], 1 }

</bundles_post_ra>
